<compile_context>
chip_gen: v7x
topology: tpu7x:2x2x1
jax: 0.10.0
libtpu: 0.0.40
codegen_flags: <defaults>
</compile_context>

<pallas_src>
import functools

import jax
import jax.numpy as jnp
from jax.experimental import pallas as pl
from jax.experimental.pallas import tpu as pltpu


# ----------------------------------------------------------------------------
# Kernel
# ----------------------------------------------------------------------------
def _lstm_recurrent_kernel(gx_ref, whh_hbm_ref, h_out_ref,
                           whh_vmem, h_ref, c_ref, dma_sem, *,
                           hidden_pad, time_chunk, compute_dtype, unroll):
    """One grid step == `time_chunk` LSTM timesteps for one batch block.

    gx_ref      : (Tc, Bb, 4Hp)  precomputed x_t @ W_ih^T + b_ih + b_hh
    whh_hbm_ref : (Hp, 4Hp)      hidden->gates weight (transposed), HBM (pl.ANY)
    h_out_ref   : (Tc, Bb, Hp)   hidden states for this chunk
    whh_vmem    : (Hp, 4Hp)      single-buffered VMEM copy of the weight
    h_ref,c_ref : (Bb, Hp)       recurrent carries (VMEM scratch, persist)
    dma_sem     : DMA semaphore for the one-shot weight copy
    """
    Hp = hidden_pad
    t_idx = pl.program_id(1)          # time-chunk index (sequential)

    @pl.when(t_idx == 0)
    def _():
        # Zero-init carries for this batch block and stage the loop-invariant
        # recurrent weight into VMEM exactly once per batch-block sweep.
        h_ref[...] = jnp.zeros_like(h_ref)
        c_ref[...] = jnp.zeros_like(c_ref)
        cp = pltpu.make_async_copy(whh_hbm_ref, whh_vmem, dma_sem)
        cp.start()
        cp.wait()

    whh = whh_vmem[...]                                    # (Hp, 4Hp)

    def step(s, carry):
        h_prev = h_ref[...]                                # (Bb, Hp) f32
        c_prev = c_ref[...]

        # Only the recurrent matmul remains on the serial critical path.
        gates = (gx_ref[s].astype(jnp.float32) +
                 jnp.dot(h_prev.astype(compute_dtype), whh,
                         preferred_element_type=jnp.float32))

        # PyTorch gate order: input, forget, cell(g), output.
        # Each slice is a whole multiple of 128 lanes (Hp % 128 == 0).
        i_g = jax.nn.sigmoid(gates[:, 0 * Hp:1 * Hp])
        f_g = jax.nn.sigmoid(gates[:, 1 * Hp:2 * Hp])
        g_g = jnp.tanh(gates[:, 2 * Hp:3 * Hp])
        o_g = jax.nn.sigmoid(gates[:, 3 * Hp:4 * Hp])

        c_new = f_g * c_prev + i_g * g_g
        h_new = o_g * jnp.tanh(c_new)

        c_ref[...] = c_new
        h_ref[...] = h_new
        h_out_ref[s] = h_new.astype(h_out_ref.dtype)       # lane-dense store
        return carry

    # Partial unroll keeps LLO visibility even for large chunks.
    jax.lax.fori_loop(0, time_chunk, step, 0, unroll=unroll)


# ----------------------------------------------------------------------------
# Sizing helpers
# ----------------------------------------------------------------------------
def _round_up(x, m):
    return ((x + m - 1) // m) * m


def _vmem_limit_bytes():
    """Per-generation scoped-VMEM budget (v7x: 64 MiB phys, v5e/v6e: 128)."""
    phys = 64 << 20                      # conservative default (v7x per-TC)
    try:
        info = pltpu.get_tpu_info()
        cap = getattr(info, "vmem_capacity_bytes", None)
        if cap:
            phys = int(cap)
    except Exception:
        pass
    # Leave headroom for Mosaic-internal scratch; cap around ~100 MiB.
    return int(min(phys - (16 << 20), 100 << 20))


def _auto_time_chunk(T, B_blk, Hp, stream_itemsize, compute_itemsize,
                     vmem_limit):
    """Pick Tc so double-buffered gates_x + h_out blocks fill most of VMEM."""
    fixed = Hp * 4 * Hp * compute_itemsize        # resident W_hh^T (1 copy)
    fixed += 2 * B_blk * Hp * 4                   # f32 h/c carries
    per_t = 2 * B_blk * 4 * Hp * stream_itemsize  # gates_x block, 2-buffered
    per_t += 2 * B_blk * Hp * stream_itemsize     # h_out block,  2-buffered
    budget = vmem_limit - fixed - (8 << 20)       # compiler headroom
    tc = max(1, budget // max(per_t, 1))
    return int(max(1, min(tc, T, 1024)))


def _pad_gate_blocks(a, H, Hp, axis=0):
    """Pad each of the 4 stacked gate blocks (size H) to size Hp along axis."""
    parts = jnp.split(a, 4, axis=axis)
    pads = [(0, 0)] * a.ndim
    pads[axis] = (0, Hp - H)
    return jnp.concatenate([jnp.pad(p, pads) for p in parts], axis=axis)


# ----------------------------------------------------------------------------
# Forward wrapper
# ----------------------------------------------------------------------------
def lstm_model_forward(x, params, *, hidden_size, time_chunk=None,
                       compute_dtype=jnp.bfloat16, stream_dtype=jnp.bfloat16):
    """x: (batch, seq, input_size) f32 -> (batch, seq, output_size) f32.

    compute_dtype : dtype of the recurrent matmul operands (f32 acc always).
    stream_dtype  : dtype of the HBM-streamed gates_x and h_out tensors.
    float32 for both reproduces the PyTorch reference to ~1e-5; the bfloat16
    defaults are ~3-4x faster on the MXU and halve the HBM streams.
    """
    w_ih, w_hh, b_ih, b_hh, w_fc, b_fc = (
        params["w_ih"], params["w_hh"], params["b_ih"],
        params["b_hh"], params["w_fc"], params["b_fc"])

    B, T, I = x.shape
    H = hidden_size
    O = w_fc.shape[0]

    # ---- Lane/sublane-aligned padding --------------------------------------
    Hp = _round_up(H, 128)                         # lane-dense gates & h
    B_pad = _round_up(B, 8)                        # sublane-aligned rows

    # Re-block per gate so each gate occupies its own Hp-wide lane block.
    w_ih_p = _pad_gate_blocks(w_ih, H, Hp, axis=0)                 # (4Hp, I)
    bias_p = _pad_gate_blocks(b_ih + b_hh, H, Hp, axis=0)          # (4Hp,)
    w_hh_p = _pad_gate_blocks(w_hh, H, Hp, axis=0)                 # (4Hp, H)
    w_hh_p = jnp.pad(w_hh_p, ((0, 0), (0, Hp - H)))                # (4Hp, Hp)
    whh_t = w_hh_p.T.astype(compute_dtype)                         # (Hp, 4Hp)

    x_p = jnp.pad(x, ((0, B_pad - B), (0, 0), (0, 0)))             # (Bp, T, I)

    # ---- Hoisted, fully-parallel input projection (all timesteps) ----------
    # gates_x[t, b, :] = x[b, t, :] @ W_ih^T + (b_ih + b_hh)   -> (T, Bp, 4Hp)
    # TODO(synk): optionally fuse this per-chunk into the kernel (keep W_ih
    # resident in VMEM) to avoid the HBM roundtrip of gates_x when HBM-bound.
    gates_x = (jnp.einsum("bti,gi->tbg", x_p, w_ih_p) +
               bias_p).astype(stream_dtype)

    # ---- Batch blocking (v7x: shard independent rows across the 2 TCs) -----
    n_batch_blocks = 2 if (B_pad >= 16 and B_pad % 16 == 0) else 1
    B_blk = B_pad // n_batch_blocks

    # ---- Time chunking sized against the per-generation VMEM budget --------
    vmem_limit = _vmem_limit_bytes()
    if time_chunk is None:
        Tc = _auto_time_chunk(T, B_blk, Hp,
                              jnp.dtype(stream_dtype).itemsize,
                              jnp.dtype(compute_dtype).itemsize,
                              vmem_limit)
    else:
        Tc = int(min(time_chunk, T))
    T_pad = _round_up(T, Tc)
    if T_pad != T:
        gates_x = jnp.pad(gates_x, ((0, T_pad - T), (0, 0), (0, 0)))
    unroll = int(max(1, min(Tc, 8)))

    kernel = functools.partial(_lstm_recurrent_kernel, hidden_pad=Hp,
                               time_chunk=Tc, compute_dtype=compute_dtype,
                               unroll=unroll)

    h_all = pl.pallas_call(
        kernel,
        out_shape=jax.ShapeDtypeStruct((T_pad, B_pad, Hp), stream_dtype),
        grid_spec=pltpu.PrefetchScalarGridSpec(
            num_scalar_prefetch=0,
            grid=(n_batch_blocks, T_pad // Tc),
            in_specs=[
                # gates_x chunk for this (batch block, time chunk)
                pl.BlockSpec((Tc, B_blk, 4 * Hp), lambda b, t: (t, b, 0)),
                # loop-invariant W_hh^T stays in HBM; DMA'd once in-kernel
                pl.BlockSpec(memory_space=pl.ANY),
            ],
            out_specs=pl.BlockSpec((Tc, B_blk, Hp), lambda b, t: (t, b, 0)),
            scratch_shapes=[
                pltpu.VMEM((Hp, 4 * Hp), compute_dtype),   # resident W_hh^T
                pltpu.VMEM((B_blk, Hp), jnp.float32),      # h carry
                pltpu.VMEM((B_blk, Hp), jnp.float32),      # c carry
                pltpu.SemaphoreType.DMA,                   # weight copy sem
            ],
        ),
        compiler_params=pltpu.CompilerParams(
            # Batch rows are independent (megacore-shardable); time is a true
            # recurrence and must stay sequential.
            dimension_semantics=("parallel", "arbitrary"),
            vmem_limit_bytes=vmem_limit,
        ),
    )(gates_x, whh_t)

    # ---- Hoisted, fully-parallel fc head ------------------------------------
    h_real = h_all[:T, :B, :H].astype(jnp.float32)         # drop all padding
    out = jnp.einsum("tbh,oh->bto", h_real, w_fc) + b_fc
    return out.astype(jnp.float32)


# ----------------------------------------------------------------------------
# Pure-JAX reference (matches the PyTorch module) & init
# ----------------------------------------------------------------------------
def _reference_forward(x, params, *, hidden_size):
    w_ih, w_hh, b_ih, b_hh, w_fc, b_fc = (
        params["w_ih"], params["w_hh"], params["b_ih"],
        params["b_hh"], params["w_fc"], params["b_fc"])
    B, T, I = x.shape
    H = hidden_size

    def step(carry, x_t):
        h, c = carry
        gates = x_t @ w_ih.T + h @ w_hh.T + b_ih + b_hh
        i_g = jax.nn.sigmoid(gates[:, 0 * H:1 * H])
        f_g = jax.nn.sigmoid(gates[:, 1 * H:2 * H])
        g_g = jnp.tanh(gates[:, 2 * H:3 * H])
        o_g = jax.nn.sigmoid(gates[:, 3 * H:4 * H])
        c_new = f_g * c + i_g * g_g
        h_new = o_g * jnp.tanh(c_new)
        return (h_new, c_new), h_new

    h0 = jnp.zeros((B, H), jnp.float32)
    c0 = jnp.zeros((B, H), jnp.float32)
    _, hs = jax.lax.scan(step, (h0, c0), jnp.transpose(x, (1, 0, 2)))
    out = hs @ w_fc.T + b_fc
    return jnp.transpose(out, (1, 0, 2))


def init_params(key, input_size, hidden_size, output_size):
    """PyTorch-style U(-1/sqrt(H), 1/sqrt(H)) init."""
    k = 1.0 / jnp.sqrt(jnp.float32(hidden_size))
    keys = jax.random.split(key, 6)
    u = lambda kk, shape: jax.random.uniform(kk, shape, jnp.float32, -k, k)
    return {
        "w_ih": u(keys[0], (4 * hidden_size, input_size)),
        "w_hh": u(keys[1], (4 * hidden_size, hidden_size)),
        "b_ih": u(keys[2], (4 * hidden_size,)),
        "b_hh": u(keys[3], (4 * hidden_size,)),
        "w_fc": u(keys[4], (output_size, hidden_size)),
        "b_fc": u(keys[5], (output_size,)),
    }


if __name__ == "__main__":
    # LSTMModel(input_size=16, hidden_size=32, output_size=8, num_layers=1,
    #           activation='relu' (unused in forward), output_type='linear')
    batch, seq, input_size, hidden_size, output_size = 2, 8, 16, 32, 8

    key = jax.random.PRNGKey(0)
    kx, kp = jax.random.split(key)
    x = jax.random.normal(kx, (batch, seq, input_size), jnp.float32)
    params = init_params(kp, input_size, hidden_size, output_size)

    ref = _reference_forward(x, params, hidden_size=hidden_size)

    # Exact-precision path: f32 everywhere, time_chunk=4 so the h/c carry is
    # exercised across grid steps.
    out_f32 = lstm_model_forward(x, params, hidden_size=hidden_size,
                                 time_chunk=4,
                                 compute_dtype=jnp.float32,
                                 stream_dtype=jnp.float32)
    out_f32 = jax.block_until_ready(out_f32)
    assert out_f32.shape == (batch, seq, output_size)
    assert jnp.allclose(out_f32, ref, atol=1e-5, rtol=1e-5), \
        "f32 kernel mismatch vs reference"

    # Default fast path: bf16 recurrent matmul + bf16 HBM streams, auto chunk.
    out_bf16 = jax.block_until_ready(
        lstm_model_forward(x, params, hidden_size=hidden_size))
    assert out_bf16.shape == (batch, seq, output_size)
    assert jnp.allclose(out_bf16, ref, atol=5e-2, rtol=5e-2), \
        "bf16 kernel mismatch vs reference"

    print("KERNEL_OK")
</pallas_src>

<mosaic_0001>
module attributes {stable_mosaic.version = 11 : i64} {
  func.func @_lstm_recurrent_kernel(%arg0: i32, %arg1: i32, %arg2: memref<4x8x512xf32, #tpu.memory_space<vmem>>, %arg3: memref<128x512xf32, #tpu.memory_space<any>>, %arg4: memref<4x8x128xf32, #tpu.memory_space<vmem>>, %arg5: memref<128x512xf32, #tpu.memory_space<vmem>>, %arg6: memref<8x128xf32, #tpu.memory_space<vmem>>, %arg7: memref<8x128xf32, #tpu.memory_space<vmem>>, %arg8: memref<!tpu.dma_semaphore, #tpu.memory_space<semaphore_mem>>) attributes {dimension_semantics = [#tpu.dimension_semantics<parallel>, #tpu.dimension_semantics<arbitrary>], iteration_bounds = array<i64: 1, 2>, scalar_prefetch = 0 : i64, scratch_operands = 4 : i64, tpu.core_type = #tpu.core_type<tc>, window_params = [{transform_indices = @transform_0, window_bounds = array<i64: 4, 8, 512>}, {}, {transform_indices = @transform_2, window_bounds = array<i64: 4, 8, 128>}]} {
    %c0_i32 = arith.constant 0 : i32
    %0 = arith.cmpi eq, %arg1, %c0_i32 : i32
    %1 = arith.extui %0 : i1 to i32
    %c0_i32_0 = arith.constant 0 : i32
    %2 = arith.cmpi ne, %1, %c0_i32_0 : i32
    scf.if %2 {
      %cst_66 = arith.constant 0.000000e+00 : f32
      %156 = vector.broadcast %cst_66 : f32 to vector<8x128xf32>
      %c0_67 = arith.constant 0 : index
      %c0_68 = arith.constant 0 : index
      %157 = vector.load %arg6[%c0_67, %c0_68] : memref<8x128xf32, #tpu.memory_space<vmem>>, vector<8x128xf32>
      tpu.vector_store %arg6[%c0_67, %c0_68], %156 {strides = array<i32>} : memref<8x128xf32, #tpu.memory_space<vmem>>, vector<8x128xf32>,
      %cst_69 = arith.constant 0.000000e+00 : f32
      %158 = vector.broadcast %cst_69 : f32 to vector<8x128xf32>
      %c0_70 = arith.constant 0 : index
      %c0_71 = arith.constant 0 : index
      %159 = vector.load %arg7[%c0_70, %c0_71] : memref<8x128xf32, #tpu.memory_space<vmem>>, vector<8x128xf32>
      tpu.vector_store %arg7[%c0_70, %c0_71], %158 {strides = array<i32>} : memref<8x128xf32, #tpu.memory_space<vmem>>, vector<8x128xf32>,
      tpu.enqueue_dma source(%arg3 : memref<128x512xf32, #tpu.memory_space<any>>) target(%arg5 : memref<128x512xf32, #tpu.memory_space<vmem>>) target_semaphore(%arg8 : memref<!tpu.dma_semaphore, #tpu.memory_space<semaphore_mem>>)
      tpu.wait_dma2 semaphore(%arg8 : memref<!tpu.dma_semaphore, #tpu.memory_space<semaphore_mem>>) src(%arg3 : memref<128x512xf32, #tpu.memory_space<any>>) dst(%arg5 : memref<128x512xf32, #tpu.memory_space<vmem>>)
    } else {
    }
    %c0 = arith.constant 0 : index
    %c0_1 = arith.constant 0 : index
    %3 = vector.load %arg5[%c0, %c0_1] : memref<128x512xf32, #tpu.memory_space<vmem>>, vector<128x512xf32>
    %c0_i32_2 = arith.constant 0 : i32
    %c0_3 = arith.constant 0 : index
    %c0_4 = arith.constant 0 : index
    %4 = vector.load %arg6[%c0_3, %c0_4] : memref<8x128xf32, #tpu.memory_space<vmem>>, vector<8x128xf32>
    %c0_5 = arith.constant 0 : index
    %c0_6 = arith.constant 0 : index
    %5 = vector.load %arg7[%c0_5, %c0_6] : memref<8x128xf32, #tpu.memory_space<vmem>>, vector<8x128xf32>
    %6 = arith.index_cast %c0_i32_2 : i32 to index
    %c0_7 = arith.constant 0 : index
    %c0_8 = arith.constant 0 : index
    %7 = vector.load %arg2[%6, %c0_7, %c0_8] : memref<4x8x512xf32, #tpu.memory_space<vmem>>, vector<1x8x512xf32>
    %8 = vector.shape_cast %7 : vector<1x8x512xf32> to vector<8x512xf32>
    %cst = arith.constant dense<0.000000e+00> : vector<8x512xf32>
    %9 = tpu.matmul %4, %3, %cst {dimension_numbers = #tpu.dot_dimension_numbers<[1], [0], [0], [1], [0, 0, 1, 1], [], []>} : vector<8x128xf32>, vector<128x512xf32>, vector<8x512xf32> -> vector<8x512xf32>
    %10 = arith.addf %8, %9 : vector<8x512xf32>
    %11 = vector.extract_strided_slice %10 {offsets = [0, 0], sizes = [8, 128], strides = [1, 1]} : vector<8x512xf32> to vector<8x128xf32>
    %12 = arith.negf %11 : vector<8x128xf32>
    %13 = math.exp %12 : vector<8x128xf32>
    %cst_9 = arith.constant 1.000000e+00 : f32
    %14 = vector.broadcast %cst_9 : f32 to vector<8x128xf32>
    %15 = arith.addf %14, %13 : vector<8x128xf32>
    %16 = arith.divf %14, %15 : vector<8x128xf32>
    %17 = vector.extract_strided_slice %10 {offsets = [0, 128], sizes = [8, 128], strides = [1, 1]} : vector<8x512xf32> to vector<8x128xf32>
    %18 = arith.negf %17 : vector<8x128xf32>
    %19 = math.exp %18 : vector<8x128xf32>
    %cst_10 = arith.constant 1.000000e+00 : f32
    %20 = vector.broadcast %cst_10 : f32 to vector<8x128xf32>
    %21 = arith.addf %20, %19 : vector<8x128xf32>
    %22 = arith.divf %20, %21 : vector<8x128xf32>
    %23 = vector.extract_strided_slice %10 {offsets = [0, 256], sizes = [8, 128], strides = [1, 1]} : vector<8x512xf32> to vector<8x128xf32>
    %24 = math.tanh %23 : vector<8x128xf32>
    %25 = vector.extract_strided_slice %10 {offsets = [0, 384], sizes = [8, 128], strides = [1, 1]} : vector<8x512xf32> to vector<8x128xf32>
    %26 = arith.negf %25 : vector<8x128xf32>
    %27 = math.exp %26 : vector<8x128xf32>
    %cst_11 = arith.constant 1.000000e+00 : f32
    %28 = vector.broadcast %cst_11 : f32 to vector<8x128xf32>
    %29 = arith.addf %28, %27 : vector<8x128xf32>
    %30 = arith.divf %28, %29 : vector<8x128xf32>
    %31 = arith.mulf %22, %5 : vector<8x128xf32>
    %32 = arith.mulf %16, %24 : vector<8x128xf32>
    %33 = arith.addf %31, %32 : vector<8x128xf32>
    %34 = math.tanh %33 : vector<8x128xf32>
    %35 = arith.mulf %30, %34 : vector<8x128xf32>
    %c0_12 = arith.constant 0 : index
    %c0_13 = arith.constant 0 : index
    %36 = vector.load %arg7[%c0_12, %c0_13] : memref<8x128xf32, #tpu.memory_space<vmem>>, vector<8x128xf32>
    tpu.vector_store %arg7[%c0_12, %c0_13], %33 {strides = array<i32>} : memref<8x128xf32, #tpu.memory_space<vmem>>, vector<8x128xf32>,
    %c0_14 = arith.constant 0 : index
    %c0_15 = arith.constant 0 : index
    %37 = vector.load %arg6[%c0_14, %c0_15] : memref<8x128xf32, #tpu.memory_space<vmem>>, vector<8x128xf32>
    tpu.vector_store %arg6[%c0_14, %c0_15], %35 {strides = array<i32>} : memref<8x128xf32, #tpu.memory_space<vmem>>, vector<8x128xf32>,
    %38 = arith.index_cast %c0_i32_2 : i32 to index
    %c0_16 = arith.constant 0 : index
    %c0_17 = arith.constant 0 : index
    %39 = vector.load %arg4[%38, %c0_16, %c0_17] : memref<4x8x128xf32, #tpu.memory_space<vmem>>, vector<1x8x128xf32>
    %40 = vector.shape_cast %39 : vector<1x8x128xf32> to vector<8x128xf32>
    %41 = vector.shape_cast %35 : vector<8x128xf32> to vector<1x8x128xf32>
    tpu.vector_store %arg4[%38, %c0_16, %c0_17], %41 {strides = array<i32>} : memref<4x8x128xf32, #tpu.memory_space<vmem>>, vector<1x8x128xf32>,
    %c1_i32 = arith.constant 1 : i32
    %c0_18 = arith.constant 0 : index
    %c0_19 = arith.constant 0 : index
    %42 = vector.load %arg6[%c0_18, %c0_19] : memref<8x128xf32, #tpu.memory_space<vmem>>, vector<8x128xf32>
    %c0_20 = arith.constant 0 : index
    %c0_21 = arith.constant 0 : index
    %43 = vector.load %arg7[%c0_20, %c0_21] : memref<8x128xf32, #tpu.memory_space<vmem>>, vector<8x128xf32>
    %44 = arith.index_cast %c1_i32 : i32 to index
    %c0_22 = arith.constant 0 : index
    %c0_23 = arith.constant 0 : index
    %45 = vector.load %arg2[%44, %c0_22, %c0_23] : memref<4x8x512xf32, #tpu.memory_space<vmem>>, vector<1x8x512xf32>
    %46 = vector.shape_cast %45 : vector<1x8x512xf32> to vector<8x512xf32>
    %cst_24 = arith.constant dense<0.000000e+00> : vector<8x512xf32>
    %47 = tpu.matmul %42, %3, %cst_24 {dimension_numbers = #tpu.dot_dimension_numbers<[1], [0], [0], [1], [0, 0, 1, 1], [], []>} : vector<8x128xf32>, vector<128x512xf32>, vector<8x512xf32> -> vector<8x512xf32>
    %48 = arith.addf %46, %47 : vector<8x512xf32>
    %49 = vector.extract_strided_slice %48 {offsets = [0, 0], sizes = [8, 128], strides = [1, 1]} : vector<8x512xf32> to vector<8x128xf32>
    %50 = arith.negf %49 : vector<8x128xf32>
    %51 = math.exp %50 : vector<8x128xf32>
    %cst_25 = arith.constant 1.000000e+00 : f32
    %52 = vector.broadcast %cst_25 : f32 to vector<8x128xf32>
    %53 = arith.addf %52, %51 : vector<8x128xf32>
    %54 = arith.divf %52, %53 : vector<8x128xf32>
    %55 = vector.extract_strided_slice %48 {offsets = [0, 128], sizes = [8, 128], strides = [1, 1]} : vector<8x512xf32> to vector<8x128xf32>
    %56 = arith.negf %55 : vector<8x128xf32>
    %57 = math.exp %56 : vector<8x128xf32>
    %cst_26 = arith.constant 1.000000e+00 : f32
    %58 = vector.broadcast %cst_26 : f32 to vector<8x128xf32>
    %59 = arith.addf %58, %57 : vector<8x128xf32>
    %60 = arith.divf %58, %59 : vector<8x128xf32>
    %61 = vector.extract_strided_slice %48 {offsets = [0, 256], sizes = [8, 128], strides = [1, 1]} : vector<8x512xf32> to vector<8x128xf32>
    %62 = math.tanh %61 : vector<8x128xf32>
    %63 = vector.extract_strided_slice %48 {offsets = [0, 384], sizes = [8, 128], strides = [1, 1]} : vector<8x512xf32> to vector<8x128xf32>
    %64 = arith.negf %63 : vector<8x128xf32>
    %65 = math.exp %64 : vector<8x128xf32>
    %cst_27 = arith.constant 1.000000e+00 : f32
    %66 = vector.broadcast %cst_27 : f32 to vector<8x128xf32>
    %67 = arith.addf %66, %65 : vector<8x128xf32>
    %68 = arith.divf %66, %67 : vector<8x128xf32>
    %69 = arith.mulf %60, %43 : vector<8x128xf32>
    %70 = arith.mulf %54, %62 : vector<8x128xf32>
    %71 = arith.addf %69, %70 : vector<8x128xf32>
    %72 = math.tanh %71 : vector<8x128xf32>
    %73 = arith.mulf %68, %72 : vector<8x128xf32>
    %c0_28 = arith.constant 0 : index
    %c0_29 = arith.constant 0 : index
    %74 = vector.load %arg7[%c0_28, %c0_29] : memref<8x128xf32, #tpu.memory_space<vmem>>, vector<8x128xf32>
    tpu.vector_store %arg7[%c0_28, %c0_29], %71 {strides = array<i32>} : memref<8x128xf32, #tpu.memory_space<vmem>>, vector<8x128xf32>,
    %c0_30 = arith.constant 0 : index
    %c0_31 = arith.constant 0 : index
    %75 = vector.load %arg6[%c0_30, %c0_31] : memref<8x128xf32, #tpu.memory_space<vmem>>, vector<8x128xf32>
    tpu.vector_store %arg6[%c0_30, %c0_31], %73 {strides = array<i32>} : memref<8x128xf32, #tpu.memory_space<vmem>>, vector<8x128xf32>,
    %76 = arith.index_cast %c1_i32 : i32 to index
    %c0_32 = arith.constant 0 : index
    %c0_33 = arith.constant 0 : index
    %77 = vector.load %arg4[%76, %c0_32, %c0_33] : memref<4x8x128xf32, #tpu.memory_space<vmem>>, vector<1x8x128xf32>
    %78 = vector.shape_cast %77 : vector<1x8x128xf32> to vector<8x128xf32>
    %79 = vector.shape_cast %73 : vector<8x128xf32> to vector<1x8x128xf32>
    tpu.vector_store %arg4[%76, %c0_32, %c0_33], %79 {strides = array<i32>} : memref<4x8x128xf32, #tpu.memory_space<vmem>>, vector<1x8x128xf32>,
    %c2_i32 = arith.constant 2 : i32
    %c0_34 = arith.constant 0 : index
    %c0_35 = arith.constant 0 : index
    %80 = vector.load %arg6[%c0_34, %c0_35] : memref<8x128xf32, #tpu.memory_space<vmem>>, vector<8x128xf32>
    %c0_36 = arith.constant 0 : index
    %c0_37 = arith.constant 0 : index
    %81 = vector.load %arg7[%c0_36, %c0_37] : memref<8x128xf32, #tpu.memory_space<vmem>>, vector<8x128xf32>
    %82 = arith.index_cast %c2_i32 : i32 to index
    %c0_38 = arith.constant 0 : index
    %c0_39 = arith.constant 0 : index
    %83 = vector.load %arg2[%82, %c0_38, %c0_39] : memref<4x8x512xf32, #tpu.memory_space<vmem>>, vector<1x8x512xf32>
    %84 = vector.shape_cast %83 : vector<1x8x512xf32> to vector<8x512xf32>
    %cst_40 = arith.constant dense<0.000000e+00> : vector<8x512xf32>
    %85 = tpu.matmul %80, %3, %cst_40 {dimension_numbers = #tpu.dot_dimension_numbers<[1], [0], [0], [1], [0, 0, 1, 1], [], []>} : vector<8x128xf32>, vector<128x512xf32>, vector<8x512xf32> -> vector<8x512xf32>
    %86 = arith.addf %84, %85 : vector<8x512xf32>
    %87 = vector.extract_strided_slice %86 {offsets = [0, 0], sizes = [8, 128], strides = [1, 1]} : vector<8x512xf32> to vector<8x128xf32>
    %88 = arith.negf %87 : vector<8x128xf32>
    %89 = math.exp %88 : vector<8x128xf32>
    %cst_41 = arith.constant 1.000000e+00 : f32
    %90 = vector.broadcast %cst_41 : f32 to vector<8x128xf32>
    %91 = arith.addf %90, %89 : vector<8x128xf32>
    %92 = arith.divf %90, %91 : vector<8x128xf32>
    %93 = vector.extract_strided_slice %86 {offsets = [0, 128], sizes = [8, 128], strides = [1, 1]} : vector<8x512xf32> to vector<8x128xf32>
    %94 = arith.negf %93 : vector<8x128xf32>
    %95 = math.exp %94 : vector<8x128xf32>
    %cst_42 = arith.constant 1.000000e+00 : f32
    %96 = vector.broadcast %cst_42 : f32 to vector<8x128xf32>
    %97 = arith.addf %96, %95 : vector<8x128xf32>
    %98 = arith.divf %96, %97 : vector<8x128xf32>
    %99 = vector.extract_strided_slice %86 {offsets = [0, 256], sizes = [8, 128], strides = [1, 1]} : vector<8x512xf32> to vector<8x128xf32>
    %100 = math.tanh %99 : vector<8x128xf32>
    %101 = vector.extract_strided_slice %86 {offsets = [0, 384], sizes = [8, 128], strides = [1, 1]} : vector<8x512xf32> to vector<8x128xf32>
    %102 = arith.negf %101 : vector<8x128xf32>
    %103 = math.exp %102 : vector<8x128xf32>
    %cst_43 = arith.constant 1.000000e+00 : f32
    %104 = vector.broadcast %cst_43 : f32 to vector<8x128xf32>
    %105 = arith.addf %104, %103 : vector<8x128xf32>
    %106 = arith.divf %104, %105 : vector<8x128xf32>
    %107 = arith.mulf %98, %81 : vector<8x128xf32>
    %108 = arith.mulf %92, %100 : vector<8x128xf32>
    %109 = arith.addf %107, %108 : vector<8x128xf32>
    %110 = math.tanh %109 : vector<8x128xf32>
    %111 = arith.mulf %106, %110 : vector<8x128xf32>
    %c0_44 = arith.constant 0 : index
    %c0_45 = arith.constant 0 : index
    %112 = vector.load %arg7[%c0_44, %c0_45] : memref<8x128xf32, #tpu.memory_space<vmem>>, vector<8x128xf32>
    tpu.vector_store %arg7[%c0_44, %c0_45], %109 {strides = array<i32>} : memref<8x128xf32, #tpu.memory_space<vmem>>, vector<8x128xf32>,
    %c0_46 = arith.constant 0 : index
    %c0_47 = arith.constant 0 : index
    %113 = vector.load %arg6[%c0_46, %c0_47] : memref<8x128xf32, #tpu.memory_space<vmem>>, vector<8x128xf32>
    tpu.vector_store %arg6[%c0_46, %c0_47], %111 {strides = array<i32>} : memref<8x128xf32, #tpu.memory_space<vmem>>, vector<8x128xf32>,
    %114 = arith.index_cast %c2_i32 : i32 to index
    %c0_48 = arith.constant 0 : index
    %c0_49 = arith.constant 0 : index
    %115 = vector.load %arg4[%114, %c0_48, %c0_49] : memref<4x8x128xf32, #tpu.memory_space<vmem>>, vector<1x8x128xf32>
    %116 = vector.shape_cast %115 : vector<1x8x128xf32> to vector<8x128xf32>
    %117 = vector.shape_cast %111 : vector<8x128xf32> to vector<1x8x128xf32>
    tpu.vector_store %arg4[%114, %c0_48, %c0_49], %117 {strides = array<i32>} : memref<4x8x128xf32, #tpu.memory_space<vmem>>, vector<1x8x128xf32>,
    %c3_i32 = arith.constant 3 : i32
    %c0_50 = arith.constant 0 : index
    %c0_51 = arith.constant 0 : index
    %118 = vector.load %arg6[%c0_50, %c0_51] : memref<8x128xf32, #tpu.memory_space<vmem>>, vector<8x128xf32>
    %c0_52 = arith.constant 0 : index
    %c0_53 = arith.constant 0 : index
    %119 = vector.load %arg7[%c0_52, %c0_53] : memref<8x128xf32, #tpu.memory_space<vmem>>, vector<8x128xf32>
    %120 = arith.index_cast %c3_i32 : i32 to index
    %c0_54 = arith.constant 0 : index
    %c0_55 = arith.constant 0 : index
    %121 = vector.load %arg2[%120, %c0_54, %c0_55] : memref<4x8x512xf32, #tpu.memory_space<vmem>>, vector<1x8x512xf32>
    %122 = vector.shape_cast %121 : vector<1x8x512xf32> to vector<8x512xf32>
    %cst_56 = arith.constant dense<0.000000e+00> : vector<8x512xf32>
    %123 = tpu.matmul %118, %3, %cst_56 {dimension_numbers = #tpu.dot_dimension_numbers<[1], [0], [0], [1], [0, 0, 1, 1], [], []>} : vector<8x128xf32>, vector<128x512xf32>, vector<8x512xf32> -> vector<8x512xf32>
    %124 = arith.addf %122, %123 : vector<8x512xf32>
    %125 = vector.extract_strided_slice %124 {offsets = [0, 0], sizes = [8, 128], strides = [1, 1]} : vector<8x512xf32> to vector<8x128xf32>
    %126 = arith.negf %125 : vector<8x128xf32>
    %127 = math.exp %126 : vector<8x128xf32>
    %cst_57 = arith.constant 1.000000e+00 : f32
    %128 = vector.broadcast %cst_57 : f32 to vector<8x128xf32>
    %129 = arith.addf %128, %127 : vector<8x128xf32>
    %130 = arith.divf %128, %129 : vector<8x128xf32>
    %131 = vector.extract_strided_slice %124 {offsets = [0, 128], sizes = [8, 128], strides = [1, 1]} : vector<8x512xf32> to vector<8x128xf32>
    %132 = arith.negf %131 : vector<8x128xf32>
    %133 = math.exp %132 : vector<8x128xf32>
    %cst_58 = arith.constant 1.000000e+00 : f32
    %134 = vector.broadcast %cst_58 : f32 to vector<8x128xf32>
    %135 = arith.addf %134, %133 : vector<8x128xf32>
    %136 = arith.divf %134, %135 : vector<8x128xf32>
    %137 = vector.extract_strided_slice %124 {offsets = [0, 256], sizes = [8, 128], strides = [1, 1]} : vector<8x512xf32> to vector<8x128xf32>
    %138 = math.tanh %137 : vector<8x128xf32>
    %139 = vector.extract_strided_slice %124 {offsets = [0, 384], sizes = [8, 128], strides = [1, 1]} : vector<8x512xf32> to vector<8x128xf32>
    %140 = arith.negf %139 : vector<8x128xf32>
    %141 = math.exp %140 : vector<8x128xf32>
    %cst_59 = arith.constant 1.000000e+00 : f32
    %142 = vector.broadcast %cst_59 : f32 to vector<8x128xf32>
    %143 = arith.addf %142, %141 : vector<8x128xf32>
    %144 = arith.divf %142, %143 : vector<8x128xf32>
    %145 = arith.mulf %136, %119 : vector<8x128xf32>
    %146 = arith.mulf %130, %138 : vector<8x128xf32>
    %147 = arith.addf %145, %146 : vector<8x128xf32>
    %148 = math.tanh %147 : vector<8x128xf32>
    %149 = arith.mulf %144, %148 : vector<8x128xf32>
    %c0_60 = arith.constant 0 : index
    %c0_61 = arith.constant 0 : index
    %150 = vector.load %arg7[%c0_60, %c0_61] : memref<8x128xf32, #tpu.memory_space<vmem>>, vector<8x128xf32>
    tpu.vector_store %arg7[%c0_60, %c0_61], %147 {strides = array<i32>} : memref<8x128xf32, #tpu.memory_space<vmem>>, vector<8x128xf32>,
    %c0_62 = arith.constant 0 : index
    %c0_63 = arith.constant 0 : index
    %151 = vector.load %arg6[%c0_62, %c0_63] : memref<8x128xf32, #tpu.memory_space<vmem>>, vector<8x128xf32>
    tpu.vector_store %arg6[%c0_62, %c0_63], %149 {strides = array<i32>} : memref<8x128xf32, #tpu.memory_space<vmem>>, vector<8x128xf32>,
    %152 = arith.index_cast %c3_i32 : i32 to index
    %c0_64 = arith.constant 0 : index
    %c0_65 = arith.constant 0 : index
    %153 = vector.load %arg4[%152, %c0_64, %c0_65] : memref<4x8x128xf32, #tpu.memory_space<vmem>>, vector<1x8x128xf32>
    %154 = vector.shape_cast %153 : vector<1x8x128xf32> to vector<8x128xf32>
    %155 = vector.shape_cast %149 : vector<8x128xf32> to vector<1x8x128xf32>
    tpu.vector_store %arg4[%152, %c0_64, %c0_65], %155 {strides = array<i32>} : memref<4x8x128xf32, #tpu.memory_space<vmem>>, vector<1x8x128xf32>,
    %c4_i32 = arith.constant 4 : i32
    return
  }
  func.func @transform_0(%arg0: i32, %arg1: i32) -> (i32, i32, i32) {
    %c0_i32 = arith.constant 0 : i32
    %c0_i32_0 = arith.constant 0 : i32
    return %arg1, %arg0, %c0_i32 : i32, i32, i32
  }
  func.func @transform_2(%arg0: i32, %arg1: i32) -> (i32, i32, i32) {
    %c0_i32 = arith.constant 0 : i32
    %c0_i32_0 = arith.constant 0 : i32
    return %arg1, %arg0, %c0_i32 : i32, i32, i32
  }
}

</mosaic_0001>

<bundles_post_ra>
// kernel: tpu_custom_call.1
= control target key start
LH: loop header
LB: loop body
LE: loop exit
PB: predicated region body
PF: predicated region fallthrough
CT: control target
= control target key end

     0   :  { %7 = vsyncpa [#allocation7], 0  ;;  %s2092_s0 = inlined_call_operand.hbm [shape: f32[8,8,512], index: 0, kind: input, shape index: {}]   ;;  %s2093_s1 = inlined_call_operand.hbm [shape: f32[128,512], index: 1, kind: input, shape index: {}]   ;;  %s2094_s2 = inlined_call_operand.hbm [shape: f32[8,8,128], index: 2, kind: output, shape index: {}]  }
   0x1   :  { %9 = vsyncpa [#allocation7 + $0x1], 0 }
   0x2   :  { %10 = vsyncpa [#allocation8], 0 }
   0x3   :  { %12 = vsyncpa [#allocation8 + $0x1], 0  ;;  %s1670_s9 = smov 0   ;;  %s1672_s10 = smov 0  }
   0x4   :  { %s1674_s11 = smov 0   ;;  %s1676_s12 = smov 0  }
   0x5   :  { %s1678_s13 = smov 0   ;;  %s1680_s14 = smov 0  }
   0x6 LB: > { %s1071_s15 = sadd.s32 4294967295, %s1644_s14   ;;  %s1072_s16 = sadd.s32 4294967294, %s1644_s14   ;;  %s1644_s14 = sphi %s1680_s14, %s18_s14   ;;  %s1640_s13 = sphi %s1678_s13, %s2109_s13   ;;  %s1636_s12 = sphi %s1676_s12, %s2108_s12   ;;  %s1632_s11 = sphi %s1674_s11, %s2107_s11   ;;  %s1628_s10 = sphi %s1672_s10, %s2106_s10   ;;  %s1624_s9 = sphi %s1670_s9, %s2105_s9  }
   0x7   : > { %s27_s17 = sadd.s32 1, %s1640_s13  ;;  %s39_s18 = sadd.s32 1, %s1632_s11 }
   0x8   : > { %p28_p0 = scmp.ge.s32.totalorder %s27_s17, 2  ;;  %p46_p1 = scmp.ne.s32.totalorder %s1632_s11, %s1628_s10 }
   0x9   : > { %p47_p2 = scmp.eq.s32.totalorder %s1644_s14, 0  ;;  %p52_p3 = scmp.ne.s32.totalorder %s1628_s10, %s1624_s9 }
   0xa   : > { %s2111_s17 = smov (%p28_p0, %s27_s17), 0  ;;  %p53_p5 = scmp.eq.s32.totalorder %s1071_s15, 0 }
   0xb   : > { %p1711_p4 = por %p47_p2, %p46_p1  ;;  %s34_s20 = ssub.s32 %s1640_s13, %s2111_s17 }
   0xc   : > { %p78_p6 = scmp.eq.s32.totalorder %s1071_s15, 1  ;;  %p37_p7 = scmp.eq.s32.totalorder %s34_s20, 0 }
   0xd   : > { %p1717_p8 = por %p53_p5, %p52_p3  ;;  %p84_p10 = scmp.eq.s32.totalorder %s1072_s16, 1 }
   0xe   : > { %p1721_p9 = por %p78_p6, %p46_p1  ;;  %p1387_p13 = scmp.lt.s32.totalorder %s1644_s14, 2 }
   0xf   : > { %s1726_s23 = scalar_select %p37_p7, %s1632_s11, %s39_s18  }
  0x10   : > { %s2098_s22 = scalar_select %p1721_p9, 1, 0 }
  0x11   : > { %p1728_p11 = por %p84_p10, %p52_p3  ;;  %s104_s25 = sand.u32 1, %s1632_s11  }
  0x12   : > { %s1075_s26 = sshll.u32 %s104_s25, 7  ;;  %s1117_s27 = sshll.u32 %s1640_s13, 11 }
  0x13   : > { %s2099_s24 = scalar_select %p1728_p11, 1, 0 }
  0x14   : > { %s1739_s30 = scalar_lea.hbm %s2092_s0, %s1117_s27  ;;  %s108_s3 = scalar_lea.vmem [#allocation6], %s1075_s26 }
  0x15   : > { %s118_s4 = sshll.u32 %s108_s3, 4  ;;  %p1745_p0 = pnand %p1387_p13, %p1711_p4  ;;  %s1741_s4 = int_to_ptr.vmem [resolvable:$true] %s118_s4 }
  0x16   : > { %s1750_s6 = scalar_lea.sflag [#allocation7], %s104_s25  ;;  %s1508_s7 = scalar_lea.hbm %s1739_s30, 2048 }
  0x17   : > { %p1509_p2 = scmp.ne.s32.totalorder %s1739_s30, %s1508_s7  ;;  %p1510_p3 = pneg %p1745_p0 }
  0x18   : > { %s1513_s16 = scalar_lea.hbm %s2092_s0, 4096  ;;  %p1514_p4 = scmp.lt.u32.totalorder %s1739_s30, %s2092_s0 }
  0x19   : > { %p1511_p5 = pnand %p1510_p3, %p1509_p2  ;;  %p1515_p7 = scmp.lt.u32.totalorder %s1513_s16, %s1508_s7 }
  0x1a   : > { %p1517_p13 = scmp.lt.u32.totalorder %s1508_s7, %s1739_s30 }
  0x1b   : > { %p1512_p6 = pneg %p1511_p5  ;;  %p1516_p10 = por %p1515_p7, %p1514_p4 }
  0x1d   : > { %p1518_p12 = por %p1517_p13, %p1516_p10 }
  0x1f   : > { %p1519_p1 = pnand %p1518_p12, %p1512_p6 }
  0x21   : > { %1522 = shalt.err (!%p1519_p1)
}
  0x22   : > { %s1523_s20 = scalar_lea.vmem %s1741_s4, 2048  ;;  %s1646_s25 = smov [#allocation6]  }
  0x23   : > { %p1524_p2 = scmp.ne.s32.totalorder %s1741_s4, %s1523_s20  ;;  %s1528_s26 = sshll.u32 %s1646_s25, 4  ;;  %s1529_s26 = int_to_ptr.vmem [resolvable:$false] %s1528_s26 }
  0x24   : > { %s1530_s27 = scalar_lea.vmem %s1529_s26, 4096  ;;  %p1531_p9 = scmp.lt.s32.totalorder %s1741_s4, %s1529_s26 }
  0x25   : > { %p1526_p5 = pnand %p1524_p2, %p1510_p3  ;;  %p1532_p4 = scmp.lt.s32.totalorder %s1530_s27, %s1523_s20 }
  0x27   : > { %p1527_p11 = pneg %p1526_p5  ;;  %p1533_p7 = por %p1532_p4, %p1531_p9 }
  0x29   : > { %p1534_p10 = pnand %p1533_p7, %p1527_p11 }
  0x2b   : > { %1537 = shalt.err (!%p1534_p10)
}
  0x2c   : > { %s1647_s28 = smov 512   ;;  %s1648_s29 = smov 32  }
  0x2d   : > { %1382 = dma.hbm_to_vmem [thread:$0]  (!%p1745_p0), %s1739_s30, 2048, %s1741_s4, %s1750_s6, %s1647_s28, %s1647_s28, %s1648_s29  }
  0x2e   : > { %p126_p12 = scmp.lt.s32.totalorder %s1644_s14, 3  ;;  %p2101_p1 = scmp.ge.s32.totalorder %s1644_s14, 1 }
  0x30   : > { %p127_p3 = pnand %p2101_p1, %p126_p12 }
  0x31   : > { %s1782_s3 = sand.u32 (!%p127_p3), 1, %s1628_s10  }
  0x32   : > { %130 = sbr.rel (%p127_p3) target bundleno = 1162 (0x48a), region = 24  ;;  %s1080_s7 = sshll.u32 (!%p127_p3), %s1782_s3, 7 }
  0x33   : > { %s133_s8 = scalar_lea.sflag (!%p127_p3), [#allocation7], %s1782_s3  ;;  %s1786_s15 = scalar_lea.vmem (!%p127_p3), [#allocation6], %s1080_s7 }
  0x39   : > { %1613 = dma.done.wait (%p1717_p8), %s133_s8, 2048  }
  0x3a   : > { %1615 = vsyncadd (%p1717_p8), %s133_s8, 4294965248  ;;  %s1081_s30 = sshll.u32 %s1782_s3, 5  ;;  %p1082_p9 = scmp.ne.s32.totalorder %s1636_s12, 0 }
  0x3b   : > { %s1793_s4 = scalar_lea.vmem [#allocation9], %s1081_s30  ;;  %v1649_v0 = vmov (!%p1082_p9), 0.0   ;;  %s1650_s5 = smov (!%p1082_p9), [#allocation2]  }
  0x3c   : > { %160 = sbr.rel (%p1082_p9) target bundleno = 79 (0x4f), region = 32  ;;  %161 = vst [vmem:[#allocation3] sm:$0xff] (!%p1082_p9), %v1649_v0  ;;  %162 = vst [vmem:[#allocation4] sm:$0xff] (!%p1082_p9), %v1649_v0  ;;  %s170_s6 = sshll.u32 (!%p1082_p9), %s1650_s5, 4  ;;  %s171_s6 = int_to_ptr.vmem [resolvable:$true] %s170_s6 }
  0x3d   : > { %s1538_s19 = scalar_lea.hbm (!%p1082_p9), %s2093_s1, 8192 }
  0x3e   : > { %p1539_p8 = scmp.ne.s32.totalorder (!%p1082_p9), %s2093_s1, %s1538_s19  ;;  %p1542_p11 = scmp.lt.u32.totalorder (!%p1082_p9), %s1538_s19, %s2093_s1 }
  0x40   : > { %p1544_p0 = pnand (!%p1082_p9), %p1542_p11, %p1539_p8 }
  0x43   : > { %1547 = shalt.err (!%p1544_p0)  }
  0x44   : > { %s1548_s27 = scalar_lea.vmem %s171_s6, 8192  ;;  %p1553_p13 = scmp.lt.s32.totalorder %s171_s6, %s171_s6 }
  0x45   : > { %p1549_p6 = scmp.ne.s32.totalorder %s171_s6, %s1548_s27  ;;  %p1554_p2 = scmp.lt.s32.totalorder %s1548_s27, %s1548_s27 }
  0x47   : > { %p1555_p5 = por %p1554_p2, %p1553_p13 }
  0x49   : > { %p1556_p4 = pnand %p1555_p5, %p1549_p6 }
  0x4b   : > { %1559 = shalt.err (!%p1556_p4)  }
  0x4c   : > { %173 = dma.hbm_to_vmem [thread:$0]  %s2093_s1, 8192, %s171_s6, [#allocation5] }
  0x4d   : > { %1616 = dma.done.wait [#allocation5], 8192 }
  0x4e   : > { %1617 = vsyncadd [#allocation5], 4294959104 }
  0x4f PF: > { %v179_v1 = vld [vmem:[#allocation2 + $0x8] sm:$0xff]  ;;  %v178_v3 = vld [vmem:[#allocation2] sm:$0xff]  ;;  %v1651_v8 = vmov 0.0   ;;  %v181_v20 = vld [vmem:[#allocation2 + $0x18] sm:$0xff]  ;;  %s1118_s7 = sshll.u32 %s1636_s12, 9  ;;  %s979_s8 = sshll.u32 %s1793_s4, 4  ;;  %s2042_s8 = int_to_ptr.vmem [resolvable:$true] %s979_s8 }
  0x50   : > { %v183_v2 = vld [vmem:[#allocation2 + $0x28] sm:$0xff]  ;;  %v182_v5 = vld [vmem:[#allocation2 + $0x20] sm:$0xff]  ;;  %312 = vmatprep.mubr.f32.mxu0 %v1651_v8  ;;  %383 = vmatprep.mubr.f32.mxu1 %v1651_v8  ;;  %v185_v21 = vld [vmem:[#allocation2 + $0x38] sm:$0xff]  ;;  %s2040_s5 = scalar_lea.hbm %s2094_s2, %s1118_s7  ;;  %s965_s6 = scalar_lea.sflag [#allocation8], %s1782_s3 }
  0x51   : > { %v1808_v4 = vpack.c.bf16 %v183_v2, %v179_v1  ;;  %v187_v6 = vld [vmem:[#allocation2 + $0x48] sm:$0xff]  ;;  %v1812_v9 = vpack.c.bf16 %v182_v5, %v178_v3  ;;  %v186_v11 = vld [vmem:[#allocation2 + $0x40] sm:$0xff]  ;;  %v1823_v23 = vpack.c.bf16 %v185_v21, %v181_v20  ;;  %v180_v24 = vld [vmem:[#allocation2 + $0x10] sm:$0xff]  ;;  %s1560_s16 = scalar_lea.vmem %s2042_s8, 512  ;;  %p2102_p10 = scmp.ne.s32.totalorder %s2098_s22, 0 }
  0x52   : > { %v191_v7 = vld [vmem:[#allocation2 + $0x68] sm:$0xff]  ;;  %v190_v12 = vld [vmem:[#allocation2 + $0x60] sm:$0xff]  ;;  %v184_v25 = vld [vmem:[#allocation2 + $0x30] sm:$0xff]  ;;  %p1561_p7 = scmp.ne.s32.totalorder %s2042_s8, %s1560_s16  ;;  %s1652_s12 = smov [#allocation9]  }
  0x53   : > { %v1814_v10 = vpack.c.bf16 %v191_v7, %v187_v6  ;;  %v195_v13 = vld [vmem:[#allocation2 + $0x88] sm:$0xff]  ;;  %1120 = vmatprep.subr.bf16.mxu0 %v1808_v4  ;;  %v1818_v15 = vpack.c.bf16 %v190_v12, %v186_v11  ;;  %v194_v16 = vld [vmem:[#allocation2 + $0x80] sm:$0xff]  ;;  %v1825_v26 = vpack.c.bf16 %v184_v25, %v180_v24  ;;  %1152 = vmatprep.subr.bf16.mxu1 %v1823_v23  ;;  %v189_v28 = vld [vmem:[#allocation2 + $0x58] sm:$0xff]  ;;  %s1564_s18 = sshll.u32 %s1652_s12, 4  ;;  %s1565_s18 = int_to_ptr.vmem [resolvable:$false] %s1564_s18 }
  0x54   : > { %v199_v14 = vld [vmem:[#allocation2 + $0xa8] sm:$0xff]  ;;  %1122 = vmatpush1.bf16.msra.mxu0 %v1812_v9  ;;  %v198_v17 = vld [vmem:[#allocation2 + $0xa0] sm:$0xff]  ;;  %v193_v29 = vld [vmem:[#allocation2 + $0x78] sm:$0xff]  ;;  %p1562_p12 = pnand %p1561_p7, %p2102_p10  ;;  %s1566_s19 = scalar_lea.vmem %s1565_s18, 1024 }
  0x55   : > { %1124 = vmatprep.subr.bf16.mxu0 %v1814_v10  ;;  %v1821_v18 = vpack.c.bf16 %v199_v14, %v195_v13  ;;  %v203_v19 = vld [vmem:[#allocation2 + $0xc8] sm:$0xff]  ;;  %v1828_v27 = vpack.c.bf16 %v198_v17, %v194_v16  ;;  %v188_v30 = vld [vmem:[#allocation2 + $0x50] sm:$0xff]  ;;  %v202_v32 = vld [vmem:[#allocation2 + $0xc0] sm:$0xff]  ;;  %1154 = vmatpush1.bf16.msra.mxu1 %v1825_v26  ;;  %v1835_v34 = vpack.c.bf16 %v193_v29, %v189_v28  ;;  %p1567_p3 = scmp.lt.s32.totalorder %s2042_s8, %s1565_s18  ;;  %p1568_p9 = scmp.lt.s32.totalorder %s1566_s19, %s1560_s16 }
  0x56   : > { %v207_v22 = vld [vmem:[#allocation2 + $0xe8] sm:$0xff]  ;;  %v206_v33 = vld [vmem:[#allocation2 + $0xe0] sm:$0xff]  ;;  %v192_v35 = vld [vmem:[#allocation2 + $0x70] sm:$0xff]  ;;  %p1563_p1 = pneg %p1562_p12 }
  0x57   : > { %v1832_v31 = vpack.c.bf16 %v207_v22, %v203_v19  ;;  %v211_v36 = vld [vmem:[#allocation2 + $0x108] sm:$0xff]  ;;  %v1837_v38 = vpack.c.bf16 %v192_v35, %v188_v30  ;;  %v197_v39 = vld [vmem:[#allocation2 + $0x98] sm:$0xff]  ;;  %1156 = vmatprep.subr.bf16.mxu1 %v1835_v34  ;;  %v196_v41 = vld [vmem:[#allocation2 + $0x90] sm:$0xff]  ;;  %v1841_v43 = vpack.c.bf16 %v206_v33, %v202_v32  ;;  %p1569_p8 = por %p1568_p9, %p1567_p3 }
  0x58   : > { %1126 = vmatpush1.bf16.msra.mxu0 %v1818_v15  ;;  %v215_v37 = vld [vmem:[#allocation2 + $0x128] sm:$0xff]  ;;  %v201_v40 = vld [vmem:[#allocation2 + $0xb8] sm:$0xff]  ;;  %v200_v42 = vld [vmem:[#allocation2 + $0xb0] sm:$0xff] }
  0x59   : > { %1128 = vmatprep.subr.bf16.mxu0 %v1821_v18  ;;  %v210_v44 = vld [vmem:[#allocation2 + $0x100] sm:$0xff]  ;;  %v1843_v46 = vpack.c.bf16 %v201_v40, %v197_v39  ;;  %v1846_v47 = vpack.c.bf16 %v215_v37, %v211_v36  ;;  %1158 = vmatpush1.bf16.msra.mxu1 %v1837_v38  ;;  %v219_v48 = vld [vmem:[#allocation2 + $0x148] sm:$0xff]  ;;  %v1849_v49 = vpack.c.bf16 %v200_v42, %v196_v41  ;;  %v205_v50 = vld [vmem:[#allocation2 + $0xd8] sm:$0xff]  ;;  %p1570_p11 = pnand %p1569_p8, %p1563_p1 }
  0x5a   : > { %v214_v45 = vld [vmem:[#allocation2 + $0x120] sm:$0xff]  ;;  %v209_v51 = vld [vmem:[#allocation2 + $0xf8] sm:$0xff]  ;;  %v223_v52 = vld [vmem:[#allocation2 + $0x168] sm:$0xff] }
  0x5b   : > { %1160 = vmatprep.subr.bf16.mxu1 %v1843_v46  ;;  %v1852_v53 = vpack.c.bf16 %v209_v51, %v205_v50  ;;  %v204_v54 = vld [vmem:[#allocation2 + $0xd0] sm:$0xff]  ;;  %v1855_v56 = vpack.c.bf16 %v214_v45, %v210_v44  ;;  %v213_v57 = vld [vmem:[#allocation2 + $0x118] sm:$0xff]  ;;  %v1858_v59 = vpack.c.bf16 %v223_v52, %v219_v48  ;;  %v218_v60 = vld [vmem:[#allocation2 + $0x140] sm:$0xff] }
  0x5c   : > { %1130 = vmatpush1.bf16.msra.mxu0 %v1828_v27  ;;  %v208_v55 = vld [vmem:[#allocation2 + $0xf0] sm:$0xff]  ;;  %v217_v58 = vld [vmem:[#allocation2 + $0x138] sm:$0xff]  ;;  %v222_v61 = vld [vmem:[#allocation2 + $0x160] sm:$0xff] }
  0x5d   : > { %1132 = vmatprep.subr.bf16.mxu0 %v1832_v31  ;;  %1162 = vmatpush1.bf16.msra.mxu1 %v1849_v49  ;;  %v227_v62 = vld [vmem:[#allocation2 + $0x188] sm:$0xff]  ;;  %v1861_v63 = vpack.c.bf16 %v208_v55, %v204_v54  ;;  %v1864_v1 = vpack.c.bf16 %v217_v58, %v213_v57  ;;  %v212_v2 = vld [vmem:[#allocation2 + $0x110] sm:$0xff]  ;;  %v221_v5 = vld [vmem:[#allocation2 + $0x158] sm:$0xff]  ;;  %v1867_v7 = vpack.c.bf16 %v222_v61, %v218_v60 }
  0x5e   : > { %v231_v0 = vld [vmem:[#allocation2 + $0x1a8] sm:$0xff]  ;;  %1164 = vmatprep.subr.bf16.mxu1 %v1852_v53  ;;  %v216_v3 = vld [vmem:[#allocation2 + $0x130] sm:$0xff]  ;;  %v225_v6 = vld [vmem:[#allocation2 + $0x178] sm:$0xff] }
  0x5f   : > { %v1870_v11 = vpack.c.bf16 %v231_v0, %v227_v62  ;;  %v226_v12 = vld [vmem:[#allocation2 + $0x180] sm:$0xff]  ;;  %v235_v14 = vld [vmem:[#allocation2 + $0x1c8] sm:$0xff]  ;;  %v1873_v16 = vpack.c.bf16 %v216_v3, %v212_v2  ;;  %v1876_v19 = vpack.c.bf16 %v225_v6, %v221_v5  ;;  %v220_v20 = vld [vmem:[#allocation2 + $0x150] sm:$0xff] }
  0x60   : > { %1134 = vmatpush1.bf16.msra.mxu0 %v1841_v43  ;;  %v230_v13 = vld [vmem:[#allocation2 + $0x1a0] sm:$0xff]  ;;  %v239_v17 = vld [vmem:[#allocation2 + $0x1e8] sm:$0xff]  ;;  %v224_v21 = vld [vmem:[#allocation2 + $0x170] sm:$0xff] }
  0x61   : > { %1136 = vmatprep.subr.bf16.mxu0 %v1846_v47  ;;  %1166 = vmatpush1.bf16.msra.mxu1 %v1861_v63  ;;  %v229_v22 = vld [vmem:[#allocation2 + $0x198] sm:$0xff]  ;;  %v1879_v25 = vpack.c.bf16 %v230_v13, %v226_v12  ;;  %v1882_v28 = vpack.c.bf16 %v239_v17, %v235_v14  ;;  %v234_v29 = vld [vmem:[#allocation2 + $0x1c0] sm:$0xff]  ;;  %v1885_v32 = vpack.c.bf16 %v224_v21, %v220_v20  ;;  %v228_v35 = vld [vmem:[#allocation2 + $0x190] sm:$0xff] }
  0x62   : > { %1168 = vmatprep.subr.bf16.mxu1 %v1864_v1  ;;  %v233_v24 = vld [vmem:[#allocation2 + $0x1b8] sm:$0xff]  ;;  %v238_v30 = vld [vmem:[#allocation2 + $0x1e0] sm:$0xff]  ;;  %v232_v36 = vld [vmem:[#allocation2 + $0x1b0] sm:$0xff] }
  0x63   : > { %v1888_v33 = vpack.c.bf16 %v233_v24, %v229_v22  ;;  %v237_v37 = vld [vmem:[#allocation2 + $0x1d8] sm:$0xff]  ;;  %v1891_v40 = vpack.c.bf16 %v238_v30, %v234_v29  ;;  %v1895_v41 = vpack.c.bf16 %v232_v36, %v228_v35  ;;  %v236_v44 = vld [vmem:[#allocation2 + $0x1d0] sm:$0xff]  ;;  %v242_v48 = vld [vmem:[#allocation3] sm:$0xff] }
  0x64   : > { %1138 = vmatpush1.bf16.msra.mxu0 %v1855_v56  ;;  %v241_v39 = vld [vmem:[#allocation2 + $0x1f8] sm:$0xff]  ;;  %v240_v45 = vld [vmem:[#allocation2 + $0x1f0] sm:$0xff]  ;;  %v247_v62 = vld [vmem:[%s1786_s15 + $0x18] sm:$0xff] }
  0x65   : > { %1140 = vmatprep.subr.bf16.mxu0 %v1858_v59  ;;  %1170 = vmatpush1.bf16.msra.mxu1 %v1873_v16  ;;  %v1898_v42 = vpack.c.bf16 %v241_v39, %v237_v37  ;;  %v1902_v50 = vpack.c.bf16 %v240_v45, %v236_v44  ;;  %v244_v51 = vld [vmem:[%s1786_s15] sm:$0xff]  ;;  %v245_v52 = vld [vmem:[%s1786_s15 + $0x8] sm:$0xff]  ;;  %v246_v5 = vld [vmem:[%s1786_s15 + $0x10] sm:$0xff] }
  0x66   : > { %1172 = vmatprep.subr.bf16.mxu1 %v1876_v19  ;;  %v243_v24 = vld [vmem:[#allocation4] sm:$0xff] }
  0x68   : > { %1142 = vmatpush1.bf16.msra.mxu0 %v1867_v7 }
  0x69   : > { %1144 = vmatprep.subr.bf16.mxu0 %v1870_v11  ;;  %1174 = vmatpush1.bf16.msra.mxu1 %v1885_v32 }
  0x6a   : > { %1176 = vmatprep.subr.bf16.mxu1 %v1888_v33 }
  0x6c   : > { %1146 = vmatpush1.bf16.msra.mxu0 %v1879_v25 }
  0x6d   : > { %1148 = vmatprep.subr.bf16.mxu0 %v1882_v28  ;;  %1178 = vmatpush1.bf16.msra.mxu1 %v1895_v41 }
  0x6e   : > { %1180 = vmatprep.subr.bf16.mxu1 %v1898_v42 }
  0x70   : > { %1150 = vmatpush1.bf16.msra.mxu0 %v1891_v40 }
  0x71   : > { %1184 = vmatprep.subr.bf16.mxu0 %v1808_v4  ;;  %1182 = vmatpush1.bf16.msra.mxu1 %v1902_v50 }
  0x72   : > { %1216 = vmatprep.subr.bf16.mxu1 %v1823_v23 }
  0x73   : > { %313 = vmatmul.mubr.f32.vlgmr.msra.gmra.mrb[0].mxu0 %v242_v48 }
  0x74   : > { %1186 = vmatpush1.bf16.msra.mxu0 %v1812_v9  ;;  %492 = vmatprep.mubr.f32.mxu0 %v1651_v8 }
  0x75   : > { %1188 = vmatprep.subr.bf16.mxu0 %v1814_v10  ;;  %384 = vmatmul.mubr.f32.vlgmr.msra.gmra.mrb[0].mxu1 %v242_v48 }
  0x76   : > { %1218 = vmatpush1.bf16.msra.mxu1 %v1825_v26  ;;  %563 = vmatprep.mubr.f32.mxu1 %v1651_v8 }
  0x77   : > { %1220 = vmatprep.subr.bf16.mxu1 %v1835_v34 }
  0x78   : > { %1190 = vmatpush1.bf16.msra.mxu0 %v1818_v15 }
  0x79   : > { %1192 = vmatprep.subr.bf16.mxu0 %v1821_v18 }
  0x7a   : > { %1222 = vmatpush1.bf16.msra.mxu1 %v1837_v38 }
  0x7b   : > { %1224 = vmatprep.subr.bf16.mxu1 %v1843_v46 }
  0x7c   : > { %1194 = vmatpush1.bf16.msra.mxu0 %v1828_v27 }
  0x7d   : > { %1196 = vmatprep.subr.bf16.mxu0 %v1832_v31 }
  0x7e   : > { %1226 = vmatpush1.bf16.msra.mxu1 %v1849_v49 }
  0x7f   : > { %1228 = vmatprep.subr.bf16.mxu1 %v1852_v53 }
  0x80   : > { %1198 = vmatpush1.bf16.msra.mxu0 %v1841_v43 }
  0x81   : > { %1200 = vmatprep.subr.bf16.mxu0 %v1846_v47 }
  0x82   : > { %1230 = vmatpush1.bf16.msra.mxu1 %v1861_v63 }
  0x83   : > { %1232 = vmatprep.subr.bf16.mxu1 %v1864_v1 }
  0x84   : > { %1202 = vmatpush1.bf16.msra.mxu0 %v1855_v56 }
  0x85   : > { %1204 = vmatprep.subr.bf16.mxu0 %v1858_v59 }
  0x86   : > { %1234 = vmatpush1.bf16.msra.mxu1 %v1873_v16 }
  0x87   : > { %1236 = vmatprep.subr.bf16.mxu1 %v1876_v19 }
  0x88   : > { %1206 = vmatpush1.bf16.msra.mxu0 %v1867_v7 }
  0x89   : > { %1208 = vmatprep.subr.bf16.mxu0 %v1870_v11 }
  0x8a   : > { %1238 = vmatpush1.bf16.msra.mxu1 %v1885_v32 }
  0x8b   : > { %1240 = vmatprep.subr.bf16.mxu1 %v1888_v33 }
  0x8c   : > { %1210 = vmatpush1.bf16.msra.mxu0 %v1879_v25 }
  0x8d   : > { %1212 = vmatprep.subr.bf16.mxu0 %v1882_v28 }
  0x8e   : > { %1242 = vmatpush1.bf16.msra.mxu1 %v1895_v41 }
  0x8f   : > { %1244 = vmatprep.subr.bf16.mxu1 %v1898_v42 }
  0x90   : > { %1214 = vmatpush1.bf16.msra.mxu0 %v1891_v40 }
  0x91   : > { %1248 = vmatprep.subr.bf16.mxu0 %v1808_v4 }
  0x92   : > { %1246 = vmatpush1.bf16.msra.mxu1 %v1902_v50 }
  0x93   : > { %1280 = vmatprep.subr.bf16.mxu1 %v1823_v23 }
 0x146   : > { %v314_v54 = vpop.f32.mrb[0].mxu0 }
 0x147   : > { %v390_v55 = vadd.f32 %v314_v54, %v244_v51  ;;  %v316_v57 = vpop.f32.mrb[1].mxu0  ;;  %v1086_v51 = vld [vmem:[%s1786_s15 + $0x20] sm:$0xff] }
 0x148   : > { %v391_v58 = vadd.f32 %v316_v57, %v245_v52  ;;  %v385_v0 = vpop.f32.mrb[0].mxu1  ;;  %v1087_v52 = vld [vmem:[%s1786_s15 + $0x28] sm:$0xff] }
 0x149   : > { %v1083_v60 = vmul.f32 -1.442695, %v390_v55  ;;  %v387_v2 = vpop.f32.mrb[1].mxu1  ;;  %v392_v12 = vadd.f32 %v385_v0, %v246_v5  ;;  %v1088_v5 = vld [vmem:[%s1786_s15 + $0x30] sm:$0xff] }
 0x14a   : > { %v1084_v61 = vmul.f32 -1.442695, %v391_v58  ;;  %v393_v3 = vadd.f32 %v387_v2, %v247_v62  ;;  %v1089_v2 = vld [vmem:[%s1786_s15 + $0x38] sm:$0xff] }
 0x14b   : > { %1444 = vpow2.f32 %v1083_v60 }
 0x14c   : > { %1446 = vpow2.f32 %v1084_v61  ;;  %v1085_v6 = vmul.f32 -1.442695, %v393_v3 }
 0x14e   : > { %1448 = vpow2.f32 %v1085_v6 }
 0x14f   : > { %1450 = vtanh.f32 %v392_v12 }
 0x155   : > { %v1445_v13 = vpop.eup %1444 }
 0x156   : > { %v1447_v14 = vpop.eup %1446  ;;  %v397_v17 = vadd.f32 1.0, %v1445_v13 }
 0x157   : > { %v403_v20 = vadd.f32 1.0, %v1447_v14 }
 0x158   : > { %1452 = vrcp.f32 %v397_v17  ;;  %v1449_v21 = vpop.eup %1448 }
 0x159   : > { %1454 = vrcp.f32 %v403_v20  ;;  %v1451_v22 = vpop.eup %1450  ;;  %v410_v30 = vadd.f32 1.0, %v1449_v21 }
 0x15b   : > { %1456 = vrcp.f32 %v410_v30 }
 0x162   : > { %v1453_v29 = vpop.eup %1452 }
 0x163   : > { %v1455_v35 = vpop.eup %1454  ;;  %v414_v36 = vmul.f32 %v1453_v29, %v1451_v22 }
 0x164   : > { %v413_v37 = vmul.f32 %v1455_v35, %v243_v24 }
 0x165   : > { %v1457_v44 = vpop.eup %1456 }
 0x166   : > { %v1946_v39 = vadd.f32 %v414_v36, %v413_v37 }
 0x168   : > { %1458 = vtanh.f32 %v1946_v39 }
 0x172   : > { %v1459_v45 = vpop.eup %1458 }
 0x173   : > { %v417_v48 = vmul.f32 %v1459_v45, %v1457_v44 }
 0x175   : > { %420 = vst [vmem:[%s1793_s4] sm:$0xff] %v417_v48  ;;  %493 = vmatmul.mubr.f32.vlgmr.msra.gmra.mrb[2].mxu0 %v417_v48  ;;  %564 = vmatmul.mubr.f32.vlgmr.msra.gmra.mrb[2].mxu1 %v417_v48 }
 0x176   : > { %1250 = vmatpush1.bf16.msra.mxu0 %v1812_v9  ;;  %1282 = vmatpush1.bf16.msra.mxu1 %v1825_v26 }
 0x177   : > { %1252 = vmatprep.subr.bf16.mxu0 %v1814_v10  ;;  %1284 = vmatprep.subr.bf16.mxu1 %v1835_v34 }
 0x178   : > { %673 = vmatprep.mubr.f32.mxu0 %v1651_v8  ;;  %744 = vmatprep.mubr.f32.mxu1 %v1651_v8 }
 0x17a   : > { %1254 = vmatpush1.bf16.msra.mxu0 %v1818_v15  ;;  %1286 = vmatpush1.bf16.msra.mxu1 %v1837_v38 }
 0x17b   : > { %1256 = vmatprep.subr.bf16.mxu0 %v1821_v18  ;;  %1288 = vmatprep.subr.bf16.mxu1 %v1843_v46 }
 0x17e   : > { %1258 = vmatpush1.bf16.msra.mxu0 %v1828_v27  ;;  %1290 = vmatpush1.bf16.msra.mxu1 %v1849_v49 }
 0x17f   : > { %1260 = vmatprep.subr.bf16.mxu0 %v1832_v31  ;;  %1292 = vmatprep.subr.bf16.mxu1 %v1852_v53 }
 0x182   : > { %1262 = vmatpush1.bf16.msra.mxu0 %v1841_v43  ;;  %1294 = vmatpush1.bf16.msra.mxu1 %v1861_v63 }
 0x183   : > { %1264 = vmatprep.subr.bf16.mxu0 %v1846_v47  ;;  %1296 = vmatprep.subr.bf16.mxu1 %v1864_v1 }
 0x186   : > { %1266 = vmatpush1.bf16.msra.mxu0 %v1855_v56  ;;  %1298 = vmatpush1.bf16.msra.mxu1 %v1873_v16 }
 0x187   : > { %1268 = vmatprep.subr.bf16.mxu0 %v1858_v59  ;;  %1300 = vmatprep.subr.bf16.mxu1 %v1876_v19 }
 0x18a   : > { %1270 = vmatpush1.bf16.msra.mxu0 %v1867_v7  ;;  %1302 = vmatpush1.bf16.msra.mxu1 %v1885_v32 }
 0x18b   : > { %1272 = vmatprep.subr.bf16.mxu0 %v1870_v11  ;;  %1304 = vmatprep.subr.bf16.mxu1 %v1888_v33 }
 0x18e   : > { %1274 = vmatpush1.bf16.msra.mxu0 %v1879_v25  ;;  %1306 = vmatpush1.bf16.msra.mxu1 %v1895_v41 }
 0x18f   : > { %1276 = vmatprep.subr.bf16.mxu0 %v1882_v28  ;;  %1308 = vmatprep.subr.bf16.mxu1 %v1898_v42 }
 0x192   : > { %1278 = vmatpush1.bf16.msra.mxu0 %v1891_v40  ;;  %1310 = vmatpush1.bf16.msra.mxu1 %v1902_v50 }
 0x193   : > { %1312 = vmatprep.subr.bf16.mxu0 %v1808_v4  ;;  %1344 = vmatprep.subr.bf16.mxu1 %v1823_v23 }
 0x248   : > { %v494_v54 = vpop.f32.mrb[2].mxu0  ;;  %v565_v55 = vpop.f32.mrb[2].mxu1 }
 0x249   : > { %v570_v57 = vadd.f32 %v1086_v51, %v494_v54  ;;  %v496_v58 = vpop.f32.mrb[3].mxu0  ;;  %v567_v60 = vpop.f32.mrb[3].mxu1  ;;  %v572_v4 = vadd.f32 %v1088_v5, %v565_v55 }
 0x24a   : > { %v571_v61 = vadd.f32 %v1087_v52, %v496_v58  ;;  %v573_v3 = vadd.f32 %v1089_v2, %v567_v60  ;;  %v1105_v60 = vld [vmem:[%s1786_s15 + $0x78] sm:$0xff] }
 0x24b   : > { %v1090_v62 = vmul.f32 -1.442695, %v570_v57 }
 0x24c   : > { %v1091_v0 = vmul.f32 -1.442695, %v571_v61  ;;  %v1092_v6 = vmul.f32 -1.442695, %v573_v3 }
 0x24d   : > { %1460 = vpow2.f32 %v1090_v62  ;;  %v1104_v62 = vld [vmem:[%s1786_s15 + $0x70] sm:$0xff] }
 0x24e   : > { %1462 = vpow2.f32 %v1091_v0 }
 0x24f   : > { %1464 = vpow2.f32 %v1092_v6 }
 0x250   : > { %1466 = vtanh.f32 %v572_v4 }
 0x257   : > { %v1461_v12 = vpop.eup %1460 }
 0x258   : > { %v1463_v13 = vpop.eup %1462  ;;  %v577_v23 = vadd.f32 1.0, %v1461_v12 }
 0x259   : > { %v583_v14 = vadd.f32 1.0, %v1463_v13  ;;  %v1465_v17 = vpop.eup %1464 }
 0x25a   : > { %1468 = vrcp.f32 %v577_v23  ;;  %v1467_v20 = vpop.eup %1466  ;;  %v590_v29 = vadd.f32 1.0, %v1465_v17 }
 0x25b   : > { %1470 = vrcp.f32 %v583_v14 }
 0x25c   : > { %1472 = vrcp.f32 %v590_v29 }
 0x264   : > { %v1469_v21 = vpop.eup %1468 }
 0x265   : > { %v1471_v22 = vpop.eup %1470  ;;  %v594_v24 = vmul.f32 %v1469_v21, %v1467_v20 }
 0x266   : > { %v593_v30 = vmul.f32 %v1471_v22, %v1946_v39  ;;  %v1473_v36 = vpop.eup %1472  ;;  %v1103_v39 = vld [vmem:[%s1786_s15 + $0x68] sm:$0xff] }
 0x268   : > { %v1989_v35 = vadd.f32 %v594_v24, %v593_v30 }
 0x26a   : > { %1474 = vtanh.f32 %v1989_v35 }
 0x274   : > { %v1475_v37 = vpop.eup %1474 }
 0x275   : > { %v597_v44 = vmul.f32 %v1475_v37, %v1473_v36 }
 0x277   : > { %1093 = vst [vmem:[%s1793_s4 + $0x8] sm:$0xff] %v597_v44  ;;  %674 = vmatmul.mubr.f32.vlgmr.msra.gmra.mrb[4].mxu0 %v597_v44  ;;  %745 = vmatmul.mubr.f32.vlgmr.msra.gmra.mrb[4].mxu1 %v597_v44 }
 0x278   : > { %1314 = vmatpush1.bf16.msra.mxu0 %v1812_v9  ;;  %1346 = vmatpush1.bf16.msra.mxu1 %v1825_v26  ;;  %v1095_v9 = vld [vmem:[%s1786_s15 + $0x48] sm:$0xff] }
 0x279   : > { %1316 = vmatprep.subr.bf16.mxu0 %v1814_v10  ;;  %1348 = vmatprep.subr.bf16.mxu1 %v1835_v34 }
 0x27a   : > { %854 = vmatprep.mubr.f32.mxu0 %v1651_v8  ;;  %925 = vmatprep.mubr.f32.mxu1 %v1651_v8  ;;  %v1094_v8 = vld [vmem:[%s1786_s15 + $0x40] sm:$0xff] }
 0x27c   : > { %1318 = vmatpush1.bf16.msra.mxu0 %v1818_v15  ;;  %1350 = vmatpush1.bf16.msra.mxu1 %v1837_v38 }
 0x27d   : > { %1320 = vmatprep.subr.bf16.mxu0 %v1821_v18  ;;  %1352 = vmatprep.subr.bf16.mxu1 %v1843_v46 }
 0x280   : > { %1322 = vmatpush1.bf16.msra.mxu0 %v1828_v27  ;;  %1354 = vmatpush1.bf16.msra.mxu1 %v1849_v49 }
 0x281   : > { %1324 = vmatprep.subr.bf16.mxu0 %v1832_v31  ;;  %1356 = vmatprep.subr.bf16.mxu1 %v1852_v53 }
 0x284   : > { %1326 = vmatpush1.bf16.msra.mxu0 %v1841_v43  ;;  %1358 = vmatpush1.bf16.msra.mxu1 %v1861_v63  ;;  %v1097_v43 = vld [vmem:[%s1786_s15 + $0x58] sm:$0xff] }
 0x285   : > { %1328 = vmatprep.subr.bf16.mxu0 %v1846_v47  ;;  %1360 = vmatprep.subr.bf16.mxu1 %v1864_v1  ;;  %v1096_v47 = vld [vmem:[%s1786_s15 + $0x50] sm:$0xff] }
 0x288   : > { %1330 = vmatpush1.bf16.msra.mxu0 %v1855_v56  ;;  %1362 = vmatpush1.bf16.msra.mxu1 %v1873_v16 }
 0x289   : > { %1332 = vmatprep.subr.bf16.mxu0 %v1858_v59  ;;  %1364 = vmatprep.subr.bf16.mxu1 %v1876_v19 }
 0x28c   : > { %1334 = vmatpush1.bf16.msra.mxu0 %v1867_v7  ;;  %1366 = vmatpush1.bf16.msra.mxu1 %v1885_v32 }
 0x28d   : > { %1336 = vmatprep.subr.bf16.mxu0 %v1870_v11  ;;  %1368 = vmatprep.subr.bf16.mxu1 %v1888_v33 }
 0x290   : > { %1338 = vmatpush1.bf16.msra.mxu0 %v1879_v25  ;;  %1370 = vmatpush1.bf16.msra.mxu1 %v1895_v41 }
 0x291   : > { %1340 = vmatprep.subr.bf16.mxu0 %v1882_v28  ;;  %1372 = vmatprep.subr.bf16.mxu1 %v1898_v42 }
 0x294   : > { %1342 = vmatpush1.bf16.msra.mxu0 %v1891_v40  ;;  %1374 = vmatpush1.bf16.msra.mxu1 %v1902_v50  ;;  %v1102_v50 = vld [vmem:[%s1786_s15 + $0x60] sm:$0xff] }
 0x34a   : > { %v675_v10 = vpop.f32.mrb[4].mxu0  ;;  %v746_v15 = vpop.f32.mrb[4].mxu1 }
 0x34b   : > { %v751_v18 = vadd.f32 %v1094_v8, %v675_v10  ;;  %v677_v26 = vpop.f32.mrb[5].mxu0  ;;  %v748_v27 = vpop.f32.mrb[5].mxu1  ;;  %v753_v53 = vadd.f32 %v1096_v47, %v746_v15 }
 0x34c   : > { %v752_v31 = vadd.f32 %v1095_v9, %v677_v26  ;;  %v754_v46 = vadd.f32 %v1097_v43, %v748_v27 }
 0x34d   : > { %v1098_v34 = vmul.f32 -1.442695, %v751_v18 }
 0x34e   : > { %v1099_v38 = vmul.f32 -1.442695, %v752_v31  ;;  %v1100_v49 = vmul.f32 -1.442695, %v754_v46 }
 0x34f   : > { %1476 = vpow2.f32 %v1098_v34 }
 0x350   : > { %1478 = vpow2.f32 %v1099_v38 }
 0x351   : > { %1480 = vpow2.f32 %v1100_v49 }
 0x352   : > { %1482 = vtanh.f32 %v753_v53 }
 0x359   : > { %v1477_v56 = vpop.eup %1476 }
 0x35a   : > { %v1479_v59 = vpop.eup %1478  ;;  %v758_v63 = vadd.f32 1.0, %v1477_v56 }
 0x35b   : > { %v764_v1 = vadd.f32 1.0, %v1479_v59  ;;  %v1481_v7 = vpop.eup %1480 }
 0x35c   : > { %1484 = vrcp.f32 %v758_v63  ;;  %v1483_v11 = vpop.eup %1482  ;;  %v771_v28 = vadd.f32 1.0, %v1481_v7 }
 0x35d   : > { %1486 = vrcp.f32 %v764_v1 }
 0x35e   : > { %1488 = vrcp.f32 %v771_v28 }
 0x366   : > { %v1485_v16 = vpop.eup %1484 }
 0x367   : > { %v1487_v19 = vpop.eup %1486  ;;  %v775_v25 = vmul.f32 %v1485_v16, %v1483_v11 }
 0x368   : > { %v774_v32 = vmul.f32 %v1487_v19, %v1989_v35  ;;  %v1489_v40 = vpop.eup %1488 }
 0x36a   : > { %v776_v33 = vadd.f32 %v775_v25, %v774_v32 }
 0x36c   : > { %1490 = vtanh.f32 %v776_v33 }
 0x376   : > { %v1491_v41 = vpop.eup %1490 }
 0x377   : > { %v778_v42 = vmul.f32 %v1491_v41, %v1489_v40 }
 0x379   : > { %1101 = vst [vmem:[%s1793_s4 + $0x10] sm:$0xff] %v778_v42  ;;  %855 = vmatmul.mubr.f32.vlgmr.msra.gmra.mrb[6].mxu0 %v778_v42  ;;  %926 = vmatmul.mubr.f32.vlgmr.msra.gmra.mrb[6].mxu1 %v778_v42 }
 0x44c   : > { %v856_v45 = vpop.f32.mrb[6].mxu0  ;;  %v927_v48 = vpop.f32.mrb[6].mxu1 }
 0x44d   : > { %v932_v51 = vadd.f32 %v1102_v50, %v856_v45  ;;  %v858_v52 = vpop.f32.mrb[7].mxu0  ;;  %v929_v54 = vpop.f32.mrb[7].mxu1  ;;  %v934_v2 = vadd.f32 %v1104_v62, %v927_v48 }
 0x44e   : > { %v933_v55 = vadd.f32 %v1103_v39, %v858_v52  ;;  %v935_v61 = vadd.f32 %v1105_v60, %v929_v54 }
 0x44f   : > { %v1106_v57 = vmul.f32 -1.442695, %v932_v51 }
 0x450   : > { %v1107_v58 = vmul.f32 -1.442695, %v933_v55  ;;  %v1108_v0 = vmul.f32 -1.442695, %v935_v61 }
 0x451   : > { %1492 = vpow2.f32 %v1106_v57 }
 0x452   : > { %1494 = vpow2.f32 %v1107_v58 }
 0x453   : > { %1496 = vpow2.f32 %v1108_v0 }
 0x454   : > { %1498 = vtanh.f32 %v934_v2 }
 0x45b   : > { %v1493_v3 = vpop.eup %1492 }
 0x45c   : > { %v1495_v5 = vpop.eup %1494  ;;  %v939_v6 = vadd.f32 1.0, %v1493_v3 }
 0x45d   : > { %v945_v4 = vadd.f32 1.0, %v1495_v5  ;;  %v1497_v12 = vpop.eup %1496 }
 0x45e   : > { %1500 = vrcp.f32 %v939_v6  ;;  %v1499_v13 = vpop.eup %1498  ;;  %v952_v20 = vadd.f32 1.0, %v1497_v12 }
 0x45f   : > { %1502 = vrcp.f32 %v945_v4 }
 0x460   : > { %1504 = vrcp.f32 %v952_v20 }
 0x468   : > { %v1501_v23 = vpop.eup %1500 }
 0x469   : > { %v1503_v14 = vpop.eup %1502  ;;  %v956_v17 = vmul.f32 %v1501_v23, %v1499_v13 }
 0x46a   : > { %v955_v21 = vmul.f32 %v1503_v14, %v776_v33  ;;  %v1505_v24 = vpop.eup %1504 }
 0x46c   : > { %v957_v22 = vadd.f32 %v956_v17, %v955_v21 }
 0x46e   : > { %1506 = vtanh.f32 %v957_v22  ;;  %960 = vst [vmem:[#allocation4] sm:$0xff] %v957_v22 }
 0x478   : > { %v1507_v29 = vpop.eup %1506 }
 0x479   : > { %v959_v30 = vmul.f32 %v1507_v29, %v1505_v24 }
 0x47b   : > { %961 = vst [vmem:[#allocation3] sm:$0xff] %v959_v30  ;;  %1109 = vst [vmem:[%s1793_s4 + $0x18] sm:$0xff] %v959_v30 }
 0x47c   : > { %1573 = shalt.err (!%p1570_p11)
}
 0x47d   : > { %s1574_s4 = scalar_lea.hbm %s2040_s5, 512  ;;  %s1578_s25 = scalar_lea.hbm %s2094_s2, 1024 }
 0x47e   : > { %p1575_p0 = scmp.ne.s32.totalorder %s2040_s5, %s1574_s4  ;;  %p1579_p2 = scmp.lt.u32.totalorder %s2040_s5, %s2094_s2 }
 0x47f   : > { %p1580_p5 = scmp.lt.u32.totalorder %s1578_s25, %s1574_s4  ;;  %p1582_p7 = scmp.lt.u32.totalorder %s1574_s4, %s2040_s5 }
 0x480   : > { %p1576_p6 = pnand %p1575_p0, %p2102_p10 }
 0x481   : > { %p1581_p4 = por %p1580_p5, %p1579_p2 }
 0x482   : > { %p1577_p13 = pneg %p1576_p6 }
 0x483   : > { %p1583_p12 = por %p1582_p7, %p1581_p4 }
 0x485   : > { %p1584_p1 = pnand %p1583_p12, %p1577_p13 }
 0x487   : > { %1587 = shalt.err (!%p1584_p1)
}
 0x488   : > { %s1653_s28 = smov 128   ;;  %s1654_s29 = smov 8  }
 0x489   : > { %1377 = dma.vmem_to_hbm [thread:$0]  (%p2102_p10), %s2042_s8, 512, %s2040_s5, %s965_s6, %s1653_s28, %s1653_s28, %s1654_s29  }
 0x48a PF: > { %s994_s7 = sand.u32 1, %s1624_s9   ;;  %p2103_p3 = scmp.ne.s32.totalorder %s2099_s24, 0 }
 0x48b   : > { %p2104_p9 = scmp.ge.s32.totalorder %s1644_s14, 2  ;;  %s995_s15 = scalar_lea.sflag [#allocation8], %s994_s7 }
 0x48d   : > { %p1384_p8 = pnand %p2104_p9, %p2103_p3 }
 0x48f   : > { %1619 = dma.done.wait (!%p1384_p8), %s995_s15, 512  }
 0x490   : > { %1621 = vsyncadd (!%p1384_p8), %s995_s15, 4294966784  ;;  %s18_s14 = sadd.s32 1, %s1644_s14   ;;  %s2105_s9 = smov %s1628_s10 }
 0x491   : > { %p15_p11 = scmp.ge.s32.totalorder %s18_s14, 4   ;;  %s2106_s10 = smov %s1632_s11 }
 0x492   : > { %s2107_s11 = smov %s1726_s23  ;;  %s2108_s12 = smov %s1640_s13 }
 0x493   : > { %s2109_s13 = smov %s2111_s17  ;;  %17 = sbr.rel (!%p15_p11) target bundleno = 6 (0x6), region = 83 }
 0x49a   :  { %1000 = vsyncpa [#allocation7], 1 }
 0x49b   :  { %1002 = vsyncpa [#allocation7 + $0x1], 1 }
 0x49c   :  { %1003 = vsyncpa [#allocation8], 1 }
 0x49d   :  { %1005 = vsyncpa [#allocation8 + $0x1], 1 }
 0x49e   :  { %1006 = vsyncmov [#allocation5] }
 0x4a1   :  { %s1007_s22 = vpop.sfrf %1006 }
 0x4a2   :  { %p1115_p10 = scmp.ne.s32.totalorder %s1007_s22, 0 }
 0x4a4   :  { %1011 = shalt.err (%p1115_p10)  }

</bundles_post_ra>
